<compile_context>
chip_gen: v6e
topology: v6e:2x2x1
jax: 0.10.0
libtpu: 0.0.40
codegen_flags: <defaults>
</compile_context>

<pallas_src>
import math

import jax
import jax.numpy as jnp
from jax.experimental import pallas as pl
from jax.experimental.pallas import tpu as pltpu

# ---- config (mirrors the PyTorch `config` dict) ----
CONFIG = {
    "word_dimension": 32,
    "model_dimension": 32,
    "image_dimension": 64,
}
NUM_WORDS = 100
EPS = 1e-12  # F.normalize default eps

WORD_DIM = CONFIG["word_dimension"]    # D  = 32
HID = CONFIG["model_dimension"]        # H  = 32
IMG_DIM = CONFIG["image_dimension"]    # 64
LANES = 4 * HID                        # 128  (gate width == lane width)
NWP = 128                              # vocab padded to a lane multiple

# packed weight-slab row layout (all offsets multiples of 8 sublanes)
ROW_EMB = 0                            # emb_proj          : rows [0, 128)
ROW_WHH = NWP                          # W_hh^T            : rows [128, 160)
ROW_BIAS = NWP + HID                   # fused bias row    : row 160 (+7 pad)
ROW_WIMG = ROW_BIAS + 8                # W_img^T (padded)  : rows [168, 232)
ROW_BIMG = ROW_WIMG + IMG_DIM          # image bias row    : row 232 (+7 pad)
SLAB_ROWS = ROW_BIMG + 8               # 240


# ---------------- fused caption-LSTM + image kernel ----------------
def fused_kernel(ids_ref, img_ref, w_ref, out_ref):
    B = img_ref.shape[0]
    TB = ids_ref.shape[0]
    T = TB // B

    # ---------- image path: (B, IMG) @ (IMG, 128) + b, then L2-normalize ----------
    # W_img^T is lane-padded (only lanes [0,H) nonzero), so padded lanes stay zero.
    wimg = w_ref[ROW_WIMG:ROW_WIMG + IMG_DIM, :]                     # (IMG, 128)
    bimg = w_ref[ROW_BIMG:ROW_BIMG + 1, :]                           # (1, 128)
    y = jnp.dot(img_ref[...], wimg,
                preferred_element_type=jnp.float32) + bimg           # (B, 128)
    inorm = jnp.sqrt(jnp.sum(y * y, axis=1, keepdims=True))
    img_rows = y / jnp.maximum(inorm, EPS)                           # (B, 128)

    # ---------- embedding lookup + input projection as ONE one-hot matmul ----------
    # xproj = onehot(ids) @ (embedding @ W_ih^T)  + (b_ih + b_hh)   [g-columns pre-scaled x2]
    ids = ids_ref[...]                                               # (T*B, 1) int32
    iota = jax.lax.broadcasted_iota(jnp.int32, (TB, NWP), 1)
    onehot = jnp.where(iota == ids, 1.0, 0.0).astype(jnp.float32)    # (T*B, 128)
    xproj = jnp.dot(onehot, w_ref[ROW_EMB:ROW_EMB + NWP, :],
                    preferred_element_type=jnp.float32) \
            + w_ref[ROW_BIAS:ROW_BIAS + 1, :]                        # (T*B, 4H)

    # ---------- T-step recurrence, fully unrolled in-kernel ----------
    whh = w_ref[ROW_WHH:ROW_WHH + HID, :]                            # (H, 4H), g-cols x2
    h = jnp.zeros((B, HID), jnp.float32)
    c = jnp.zeros((B, HID), jnp.float32)
    for t in range(T):  # statically unrolled == lax.fori_loop(..., unroll=True)
        gates = xproj[t * B:(t + 1) * B, :] + jnp.dot(
            h, whh, preferred_element_type=jnp.float32)              # (B, 4H) = [i|f|2g|o]
        sig = jax.nn.sigmoid(gates)                                  # single EUP pass
        i_g = sig[:, 0:HID]
        f_g = sig[:, HID:2 * HID]
        g_g = 2.0 * sig[:, 2 * HID:3 * HID] - 1.0                    # tanh(x) = 2*sigmoid(2x) - 1
        o_g = sig[:, 3 * HID:4 * HID]
        c = f_g * c + i_g * g_g
        h = o_g * jnp.tanh(c)

    # ---------- final L2-normalize of h_T (exact sqrt + divide, F.normalize parity) ----------
    cnorm = jnp.sqrt(jnp.sum(h * h, axis=1, keepdims=True))
    h_norm = h / jnp.maximum(cnorm, EPS)                             # (B, H)

    # ---------- single lane-dense (2B, 128) output slab ----------
    cap_rows = jnp.concatenate(
        [h_norm, jnp.zeros((B, LANES - HID), jnp.float32)], axis=1)  # (B, 128)
    out_ref[...] = jnp.concatenate([cap_rows, img_rows], axis=0)     # (2B, 128)


def fused_forward(ids2d, image, wslab):
    """ids2d: (T*B, 1) int32 time-major token ids. Returns a (2B, 128) slab
    (rows [0,B): caption embedding, rows [B,2B): image embedding; lanes [0,H) valid)."""
    TB = ids2d.shape[0]
    B, IMG = image.shape
    R, L = wslab.shape
    return pl.pallas_call(
        fused_kernel,
        out_shape=jax.ShapeDtypeStruct((2 * B, L), jnp.float32),
        grid_spec=pltpu.PrefetchScalarGridSpec(
            num_scalar_prefetch=0,
            grid=(1,),
            in_specs=[
                pl.BlockSpec((TB, 1), lambda i: (0, 0)),     # token ids
                pl.BlockSpec((B, IMG), lambda i: (0, 0)),    # image
                pl.BlockSpec((R, L), lambda i: (0, 0)),      # packed weight slab
            ],
            out_specs=pl.BlockSpec((2 * B, L), lambda i: (0, 0)),
        ),
        compiler_params=pltpu.CompilerParams(
            dimension_semantics=("arbitrary",)
        ),
        # TODO(synk): if many (sentence, image) pairs are evaluated per step, add a leading
        # "parallel" sample grid axis so the second v7x TensorCore is used.
    )(ids2d, image, wslab)


# ---------------- Model wrapper ----------------
class PallasModel:
    def __init__(self, key):
        D, H, IMG = WORD_DIM, HID, IMG_DIM
        k_emb, k_ih, k_hh, k_bih, k_bhh, k_lin = jax.random.split(key, 6)

        # Embedding table (nn.Embedding default: N(0,1))
        embedding = jax.random.normal(k_emb, (NUM_WORDS, D), jnp.float32)

        # LSTM params (PyTorch: weight_ih (4H,D), weight_hh (4H,H), biases (4H,));
        # gate order (i, f, g, o); init U(-1/sqrt(H), 1/sqrt(H)).
        s = 1.0 / math.sqrt(H)
        w_ih = jax.random.uniform(k_ih, (4 * H, D), jnp.float32, -s, s)
        w_hh = jax.random.uniform(k_hh, (4 * H, H), jnp.float32, -s, s)
        b_ih = jax.random.uniform(k_bih, (4 * H,), jnp.float32, -s, s)
        b_hh = jax.random.uniform(k_bhh, (4 * H,), jnp.float32, -s, s)

        # Linear (xavier_uniform weight (H, IMG), zero bias)
        limit = math.sqrt(6.0 / (H + IMG))
        lin_w = jax.random.uniform(k_lin, (H, IMG), jnp.float32, -limit, limit)
        lin_b = jnp.zeros((H,), jnp.float32)

        # raw params kept for the pure-JAX reference
        self.raw = dict(emb=embedding, w_ih=w_ih, w_hh=w_hh, b_ih=b_ih, b_hh=b_hh,
                        lin_w=lin_w, lin_b=lin_b)

        # ---- kernel-layout weight slab, computed ONCE at init ----
        # g-gate (columns [2H,3H)) pre-scaled by 2 for the tanh(x)=2*sigmoid(2x)-1 identity.
        g_scale = jnp.ones((4 * H,), jnp.float32).at[2 * H:3 * H].set(2.0)

        emb_pad = jnp.zeros((NWP, D), jnp.float32).at[:NUM_WORDS, :].set(embedding)
        emb_proj = (emb_pad @ w_ih.T) * g_scale[None, :]             # (128, 4H)
        whh_t = w_hh.T * g_scale[None, :]                            # (H, 4H)
        bias = ((b_ih + b_hh) * g_scale).reshape(1, 4 * H)           # (1, 4H)
        wimg_pad = jnp.zeros((IMG, LANES), jnp.float32).at[:, :H].set(lin_w.T)  # (IMG, 128)
        bimg_pad = jnp.zeros((1, LANES), jnp.float32).at[0, :H].set(lin_b)      # (1, 128)
        pad7 = jnp.zeros((7, LANES), jnp.float32)

        self.wslab = jnp.concatenate(
            [emb_proj,            # rows [0, 128)
             whh_t,               # rows [128, 160)
             bias, pad7,          # rows [160, 168)
             wimg_pad,            # rows [168, 232)
             bimg_pad, pad7],     # rows [232, 240)
            axis=0)
        assert self.wslab.shape == (SLAB_ROWS, LANES)

    def forward(self, sentence, image):
        T, B = sentence.shape
        # time-major flatten; embedding gather happens inside the kernel (one-hot matmul)
        ids2d = sentence.reshape(T * B, 1).astype(jnp.int32)
        out = fused_forward(ids2d, image.astype(jnp.float32), self.wslab)
        cap = out[0:B, 0:HID]
        img = out[B:2 * B, 0:HID]
        return cap, img  # (caption_embedding, image_embedding)


# ---------------- pure-JAX reference (PyTorch-equivalent forward) ----------------
def reference_forward(sentence, image, p):
    T, B = sentence.shape
    H = HID
    x = p["emb"][sentence]                                   # (T, B, D)
    h = jnp.zeros((B, H), jnp.float32)
    c = jnp.zeros((B, H), jnp.float32)
    for t in range(T):
        g = x[t] @ p["w_ih"].T + p["b_ih"] + h @ p["w_hh"].T + p["b_hh"]
        i_g = jax.nn.sigmoid(g[:, 0:H])
        f_g = jax.nn.sigmoid(g[:, H:2 * H])
        g_g = jnp.tanh(g[:, 2 * H:3 * H])
        o_g = jax.nn.sigmoid(g[:, 3 * H:4 * H])
        c = f_g * c + i_g * g_g
        h = o_g * jnp.tanh(c)
    cap = h / jnp.maximum(jnp.sqrt(jnp.sum(h * h, axis=1, keepdims=True)), EPS)
    y = image @ p["lin_w"].T + p["lin_b"]
    img = y / jnp.maximum(jnp.sqrt(jnp.sum(y * y, axis=1, keepdims=True)), EPS)
    return cap, img


if __name__ == "__main__":
    key = jax.random.PRNGKey(0)
    k_model, k_sent, k_img = jax.random.split(key, 3)

    T, B = 8, 4
    sentence = jax.random.randint(k_sent, (T, B), 0, NUM_WORDS, jnp.int32)
    image = jax.random.normal(k_img, (B, IMG_DIM), jnp.float32)

    model = PallasModel(k_model)
    cap_emb, img_emb = model.forward(sentence, image)
    jax.block_until_ready((cap_emb, img_emb))

    assert cap_emb.shape == (B, HID)
    assert img_emb.shape == (B, HID)

    # correctness check vs. pure-JAX reference (loose tolerance: MXU f32 matmuls may use
    # bf16 passes under default precision; structural bugs would be O(0.1-1) off)
    cap_ref, img_ref = reference_forward(sentence, image, model.raw)
    assert jnp.allclose(cap_emb, cap_ref, atol=2e-2, rtol=2e-2), "caption mismatch"
    assert jnp.allclose(img_emb, img_ref, atol=2e-2, rtol=2e-2), "image mismatch"

    print("KERNEL_OK")
</pallas_src>

<mosaic_0001>
module attributes {stable_mosaic.version = 11 : i64} {
  func.func @fused_kernel(%arg0: i32, %arg1: memref<32x1xi32, #tpu.memory_space<vmem>>, %arg2: memref<4x64xf32, #tpu.memory_space<vmem>>, %arg3: memref<240x128xf32, #tpu.memory_space<vmem>>, %arg4: memref<8x128xf32, #tpu.memory_space<vmem>>) attributes {dimension_semantics = [#tpu.dimension_semantics<arbitrary>], iteration_bounds = array<i64: 1>, scalar_prefetch = 0 : i64, scratch_operands = 0 : i64, tpu.core_type = #tpu.core_type<tc>, window_params = [{pipeline_mode = #tpu.pipeline_mode<synchronous>, transform_indices = @transform_0, window_bounds = array<i64: 32, 1>}, {pipeline_mode = #tpu.pipeline_mode<synchronous>, transform_indices = @transform_1, window_bounds = array<i64: 4, 64>}, {pipeline_mode = #tpu.pipeline_mode<synchronous>, transform_indices = @transform_2, window_bounds = array<i64: 240, 128>}, {pipeline_mode = #tpu.pipeline_mode<synchronous>, transform_indices = @transform_3, window_bounds = array<i64: 8, 128>}]} {
    %c168 = arith.constant 168 : index
    %c0 = arith.constant 0 : index
    %0 = vector.load %arg3[%c168, %c0] : memref<240x128xf32, #tpu.memory_space<vmem>>, vector<64x128xf32>
    %c232 = arith.constant 232 : index
    %c0_0 = arith.constant 0 : index
    %1 = vector.load %arg3[%c232, %c0_0] : memref<240x128xf32, #tpu.memory_space<vmem>>, vector<1x128xf32>
    %c0_1 = arith.constant 0 : index
    %c0_2 = arith.constant 0 : index
    %2 = vector.load %arg2[%c0_1, %c0_2] : memref<4x64xf32, #tpu.memory_space<vmem>>, vector<4x64xf32>
    %cst = arith.constant dense<0.000000e+00> : vector<4x128xf32>
    %3 = tpu.matmul %2, %0, %cst {dimension_numbers = #tpu.dot_dimension_numbers<[1], [0], [0], [1], [0, 0, 1, 1], [], []>} : vector<4x64xf32>, vector<64x128xf32>, vector<4x128xf32> -> vector<4x128xf32>
    %4 = vector.broadcast %1 : vector<1x128xf32> to vector<4x128xf32>
    %5 = arith.addf %3, %4 : vector<4x128xf32>
    %6 = arith.mulf %5, %5 : vector<4x128xf32>
    %cst_3 = arith.constant dense<0.000000e+00> : vector<4xf32>
    %7 = vector.multi_reduction <add>, %6, %cst_3 [1] : vector<4x128xf32> to vector<4xf32>
    %8 = vector.shape_cast %7 : vector<4xf32> to vector<4x1xf32>
    %9 = math.sqrt %8 : vector<4x1xf32>
    %cst_4 = arith.constant 9.99999996E-13 : f32
    %10 = vector.broadcast %cst_4 : f32 to vector<4x1xf32>
    %11 = arith.maximumf %9, %10 : vector<4x1xf32>
    %12 = vector.broadcast %11 : vector<4x1xf32> to vector<4x128xf32>
    %13 = arith.divf %5, %12 : vector<4x128xf32>
    %c0_5 = arith.constant 0 : index
    %c0_6 = arith.constant 0 : index
    %14 = vector.load %arg1[%c0_5, %c0_6] : memref<32x1xi32, #tpu.memory_space<vmem>>, vector<32x1xi32>
    %15 = tpu.iota {dimensions = array<i32: 1>} : vector<32x128xi32>
    %16 = vector.broadcast %14 : vector<32x1xi32> to vector<32x128xi32>
    %17 = arith.cmpi eq, %15, %16 : vector<32x128xi32>
    %cst_7 = arith.constant 1.000000e+00 : f32
    %cst_8 = arith.constant 0.000000e+00 : f32
    %18 = vector.broadcast %cst_7 : f32 to vector<32x128xf32>
    %19 = vector.broadcast %cst_8 : f32 to vector<32x128xf32>
    %20 = arith.select %17, %18, %19 : vector<32x128xi1>, vector<32x128xf32>
    %c0_9 = arith.constant 0 : index
    %c0_10 = arith.constant 0 : index
    %21 = vector.load %arg3[%c0_9, %c0_10] : memref<240x128xf32, #tpu.memory_space<vmem>>, vector<128x128xf32>
    %cst_11 = arith.constant dense<0.000000e+00> : vector<32x128xf32>
    %22 = tpu.matmul %20, %21, %cst_11 {dimension_numbers = #tpu.dot_dimension_numbers<[1], [0], [0], [1], [0, 0, 1, 1], [], []>} : vector<32x128xf32>, vector<128x128xf32>, vector<32x128xf32> -> vector<32x128xf32>
    %c160 = arith.constant 160 : index
    %c0_12 = arith.constant 0 : index
    %23 = vector.load %arg3[%c160, %c0_12] : memref<240x128xf32, #tpu.memory_space<vmem>>, vector<1x128xf32>
    %24 = vector.broadcast %23 : vector<1x128xf32> to vector<32x128xf32>
    %25 = arith.addf %22, %24 : vector<32x128xf32>
    %c128 = arith.constant 128 : index
    %c0_13 = arith.constant 0 : index
    %26 = vector.load %arg3[%c128, %c0_13] : memref<240x128xf32, #tpu.memory_space<vmem>>, vector<32x128xf32>
    %cst_14 = arith.constant 0.000000e+00 : f32
    %27 = vector.broadcast %cst_14 : f32 to vector<4x32xf32>
    %cst_15 = arith.constant 0.000000e+00 : f32
    %28 = vector.broadcast %cst_15 : f32 to vector<4x32xf32>
    %29 = vector.extract_strided_slice %25 {offsets = [0, 0], sizes = [4, 128], strides = [1, 1]} : vector<32x128xf32> to vector<4x128xf32>
    %cst_16 = arith.constant dense<0.000000e+00> : vector<4x128xf32>
    %30 = tpu.matmul %27, %26, %cst_16 {dimension_numbers = #tpu.dot_dimension_numbers<[1], [0], [0], [1], [0, 0, 1, 1], [], []>} : vector<4x32xf32>, vector<32x128xf32>, vector<4x128xf32> -> vector<4x128xf32>
    %31 = arith.addf %29, %30 : vector<4x128xf32>
    %32 = arith.negf %31 : vector<4x128xf32>
    %33 = math.exp %32 : vector<4x128xf32>
    %cst_17 = arith.constant 1.000000e+00 : f32
    %34 = vector.broadcast %cst_17 : f32 to vector<4x128xf32>
    %35 = arith.addf %34, %33 : vector<4x128xf32>
    %36 = arith.divf %34, %35 : vector<4x128xf32>
    %37 = vector.extract_strided_slice %36 {offsets = [0, 0], sizes = [4, 32], strides = [1, 1]} : vector<4x128xf32> to vector<4x32xf32>
    %38 = vector.extract_strided_slice %36 {offsets = [0, 32], sizes = [4, 32], strides = [1, 1]} : vector<4x128xf32> to vector<4x32xf32>
    %39 = vector.extract_strided_slice %36 {offsets = [0, 64], sizes = [4, 32], strides = [1, 1]} : vector<4x128xf32> to vector<4x32xf32>
    %cst_18 = arith.constant 2.000000e+00 : f32
    %40 = vector.broadcast %cst_18 : f32 to vector<4x32xf32>
    %41 = arith.mulf %40, %39 : vector<4x32xf32>
    %cst_19 = arith.constant 1.000000e+00 : f32
    %42 = vector.broadcast %cst_19 : f32 to vector<4x32xf32>
    %43 = arith.subf %41, %42 : vector<4x32xf32>
    %44 = vector.extract_strided_slice %36 {offsets = [0, 96], sizes = [4, 32], strides = [1, 1]} : vector<4x128xf32> to vector<4x32xf32>
    %45 = arith.mulf %38, %28 : vector<4x32xf32>
    %46 = arith.mulf %37, %43 : vector<4x32xf32>
    %47 = arith.addf %45, %46 : vector<4x32xf32>
    %48 = math.tanh %47 : vector<4x32xf32>
    %49 = arith.mulf %44, %48 : vector<4x32xf32>
    %50 = vector.extract_strided_slice %25 {offsets = [4, 0], sizes = [4, 128], strides = [1, 1]} : vector<32x128xf32> to vector<4x128xf32>
    %cst_20 = arith.constant dense<0.000000e+00> : vector<4x128xf32>
    %51 = tpu.matmul %49, %26, %cst_20 {dimension_numbers = #tpu.dot_dimension_numbers<[1], [0], [0], [1], [0, 0, 1, 1], [], []>} : vector<4x32xf32>, vector<32x128xf32>, vector<4x128xf32> -> vector<4x128xf32>
    %52 = arith.addf %50, %51 : vector<4x128xf32>
    %53 = arith.negf %52 : vector<4x128xf32>
    %54 = math.exp %53 : vector<4x128xf32>
    %cst_21 = arith.constant 1.000000e+00 : f32
    %55 = vector.broadcast %cst_21 : f32 to vector<4x128xf32>
    %56 = arith.addf %55, %54 : vector<4x128xf32>
    %57 = arith.divf %55, %56 : vector<4x128xf32>
    %58 = vector.extract_strided_slice %57 {offsets = [0, 0], sizes = [4, 32], strides = [1, 1]} : vector<4x128xf32> to vector<4x32xf32>
    %59 = vector.extract_strided_slice %57 {offsets = [0, 32], sizes = [4, 32], strides = [1, 1]} : vector<4x128xf32> to vector<4x32xf32>
    %60 = vector.extract_strided_slice %57 {offsets = [0, 64], sizes = [4, 32], strides = [1, 1]} : vector<4x128xf32> to vector<4x32xf32>
    %cst_22 = arith.constant 2.000000e+00 : f32
    %61 = vector.broadcast %cst_22 : f32 to vector<4x32xf32>
    %62 = arith.mulf %61, %60 : vector<4x32xf32>
    %cst_23 = arith.constant 1.000000e+00 : f32
    %63 = vector.broadcast %cst_23 : f32 to vector<4x32xf32>
    %64 = arith.subf %62, %63 : vector<4x32xf32>
    %65 = vector.extract_strided_slice %57 {offsets = [0, 96], sizes = [4, 32], strides = [1, 1]} : vector<4x128xf32> to vector<4x32xf32>
    %66 = arith.mulf %59, %47 : vector<4x32xf32>
    %67 = arith.mulf %58, %64 : vector<4x32xf32>
    %68 = arith.addf %66, %67 : vector<4x32xf32>
    %69 = math.tanh %68 : vector<4x32xf32>
    %70 = arith.mulf %65, %69 : vector<4x32xf32>
    %71 = vector.extract_strided_slice %25 {offsets = [8, 0], sizes = [4, 128], strides = [1, 1]} : vector<32x128xf32> to vector<4x128xf32>
    %cst_24 = arith.constant dense<0.000000e+00> : vector<4x128xf32>
    %72 = tpu.matmul %70, %26, %cst_24 {dimension_numbers = #tpu.dot_dimension_numbers<[1], [0], [0], [1], [0, 0, 1, 1], [], []>} : vector<4x32xf32>, vector<32x128xf32>, vector<4x128xf32> -> vector<4x128xf32>
    %73 = arith.addf %71, %72 : vector<4x128xf32>
    %74 = arith.negf %73 : vector<4x128xf32>
    %75 = math.exp %74 : vector<4x128xf32>
    %cst_25 = arith.constant 1.000000e+00 : f32
    %76 = vector.broadcast %cst_25 : f32 to vector<4x128xf32>
    %77 = arith.addf %76, %75 : vector<4x128xf32>
    %78 = arith.divf %76, %77 : vector<4x128xf32>
    %79 = vector.extract_strided_slice %78 {offsets = [0, 0], sizes = [4, 32], strides = [1, 1]} : vector<4x128xf32> to vector<4x32xf32>
    %80 = vector.extract_strided_slice %78 {offsets = [0, 32], sizes = [4, 32], strides = [1, 1]} : vector<4x128xf32> to vector<4x32xf32>
    %81 = vector.extract_strided_slice %78 {offsets = [0, 64], sizes = [4, 32], strides = [1, 1]} : vector<4x128xf32> to vector<4x32xf32>
    %cst_26 = arith.constant 2.000000e+00 : f32
    %82 = vector.broadcast %cst_26 : f32 to vector<4x32xf32>
    %83 = arith.mulf %82, %81 : vector<4x32xf32>
    %cst_27 = arith.constant 1.000000e+00 : f32
    %84 = vector.broadcast %cst_27 : f32 to vector<4x32xf32>
    %85 = arith.subf %83, %84 : vector<4x32xf32>
    %86 = vector.extract_strided_slice %78 {offsets = [0, 96], sizes = [4, 32], strides = [1, 1]} : vector<4x128xf32> to vector<4x32xf32>
    %87 = arith.mulf %80, %68 : vector<4x32xf32>
    %88 = arith.mulf %79, %85 : vector<4x32xf32>
    %89 = arith.addf %87, %88 : vector<4x32xf32>
    %90 = math.tanh %89 : vector<4x32xf32>
    %91 = arith.mulf %86, %90 : vector<4x32xf32>
    %92 = vector.extract_strided_slice %25 {offsets = [12, 0], sizes = [4, 128], strides = [1, 1]} : vector<32x128xf32> to vector<4x128xf32>
    %cst_28 = arith.constant dense<0.000000e+00> : vector<4x128xf32>
    %93 = tpu.matmul %91, %26, %cst_28 {dimension_numbers = #tpu.dot_dimension_numbers<[1], [0], [0], [1], [0, 0, 1, 1], [], []>} : vector<4x32xf32>, vector<32x128xf32>, vector<4x128xf32> -> vector<4x128xf32>
    %94 = arith.addf %92, %93 : vector<4x128xf32>
    %95 = arith.negf %94 : vector<4x128xf32>
    %96 = math.exp %95 : vector<4x128xf32>
    %cst_29 = arith.constant 1.000000e+00 : f32
    %97 = vector.broadcast %cst_29 : f32 to vector<4x128xf32>
    %98 = arith.addf %97, %96 : vector<4x128xf32>
    %99 = arith.divf %97, %98 : vector<4x128xf32>
    %100 = vector.extract_strided_slice %99 {offsets = [0, 0], sizes = [4, 32], strides = [1, 1]} : vector<4x128xf32> to vector<4x32xf32>
    %101 = vector.extract_strided_slice %99 {offsets = [0, 32], sizes = [4, 32], strides = [1, 1]} : vector<4x128xf32> to vector<4x32xf32>
    %102 = vector.extract_strided_slice %99 {offsets = [0, 64], sizes = [4, 32], strides = [1, 1]} : vector<4x128xf32> to vector<4x32xf32>
    %cst_30 = arith.constant 2.000000e+00 : f32
    %103 = vector.broadcast %cst_30 : f32 to vector<4x32xf32>
    %104 = arith.mulf %103, %102 : vector<4x32xf32>
    %cst_31 = arith.constant 1.000000e+00 : f32
    %105 = vector.broadcast %cst_31 : f32 to vector<4x32xf32>
    %106 = arith.subf %104, %105 : vector<4x32xf32>
    %107 = vector.extract_strided_slice %99 {offsets = [0, 96], sizes = [4, 32], strides = [1, 1]} : vector<4x128xf32> to vector<4x32xf32>
    %108 = arith.mulf %101, %89 : vector<4x32xf32>
    %109 = arith.mulf %100, %106 : vector<4x32xf32>
    %110 = arith.addf %108, %109 : vector<4x32xf32>
    %111 = math.tanh %110 : vector<4x32xf32>
    %112 = arith.mulf %107, %111 : vector<4x32xf32>
    %113 = vector.extract_strided_slice %25 {offsets = [16, 0], sizes = [4, 128], strides = [1, 1]} : vector<32x128xf32> to vector<4x128xf32>
    %cst_32 = arith.constant dense<0.000000e+00> : vector<4x128xf32>
    %114 = tpu.matmul %112, %26, %cst_32 {dimension_numbers = #tpu.dot_dimension_numbers<[1], [0], [0], [1], [0, 0, 1, 1], [], []>} : vector<4x32xf32>, vector<32x128xf32>, vector<4x128xf32> -> vector<4x128xf32>
    %115 = arith.addf %113, %114 : vector<4x128xf32>
    %116 = arith.negf %115 : vector<4x128xf32>
    %117 = math.exp %116 : vector<4x128xf32>
    %cst_33 = arith.constant 1.000000e+00 : f32
    %118 = vector.broadcast %cst_33 : f32 to vector<4x128xf32>
    %119 = arith.addf %118, %117 : vector<4x128xf32>
    %120 = arith.divf %118, %119 : vector<4x128xf32>
    %121 = vector.extract_strided_slice %120 {offsets = [0, 0], sizes = [4, 32], strides = [1, 1]} : vector<4x128xf32> to vector<4x32xf32>
    %122 = vector.extract_strided_slice %120 {offsets = [0, 32], sizes = [4, 32], strides = [1, 1]} : vector<4x128xf32> to vector<4x32xf32>
    %123 = vector.extract_strided_slice %120 {offsets = [0, 64], sizes = [4, 32], strides = [1, 1]} : vector<4x128xf32> to vector<4x32xf32>
    %cst_34 = arith.constant 2.000000e+00 : f32
    %124 = vector.broadcast %cst_34 : f32 to vector<4x32xf32>
    %125 = arith.mulf %124, %123 : vector<4x32xf32>
    %cst_35 = arith.constant 1.000000e+00 : f32
    %126 = vector.broadcast %cst_35 : f32 to vector<4x32xf32>
    %127 = arith.subf %125, %126 : vector<4x32xf32>
    %128 = vector.extract_strided_slice %120 {offsets = [0, 96], sizes = [4, 32], strides = [1, 1]} : vector<4x128xf32> to vector<4x32xf32>
    %129 = arith.mulf %122, %110 : vector<4x32xf32>
    %130 = arith.mulf %121, %127 : vector<4x32xf32>
    %131 = arith.addf %129, %130 : vector<4x32xf32>
    %132 = math.tanh %131 : vector<4x32xf32>
    %133 = arith.mulf %128, %132 : vector<4x32xf32>
    %134 = vector.extract_strided_slice %25 {offsets = [20, 0], sizes = [4, 128], strides = [1, 1]} : vector<32x128xf32> to vector<4x128xf32>
    %cst_36 = arith.constant dense<0.000000e+00> : vector<4x128xf32>
    %135 = tpu.matmul %133, %26, %cst_36 {dimension_numbers = #tpu.dot_dimension_numbers<[1], [0], [0], [1], [0, 0, 1, 1], [], []>} : vector<4x32xf32>, vector<32x128xf32>, vector<4x128xf32> -> vector<4x128xf32>
    %136 = arith.addf %134, %135 : vector<4x128xf32>
    %137 = arith.negf %136 : vector<4x128xf32>
    %138 = math.exp %137 : vector<4x128xf32>
    %cst_37 = arith.constant 1.000000e+00 : f32
    %139 = vector.broadcast %cst_37 : f32 to vector<4x128xf32>
    %140 = arith.addf %139, %138 : vector<4x128xf32>
    %141 = arith.divf %139, %140 : vector<4x128xf32>
    %142 = vector.extract_strided_slice %141 {offsets = [0, 0], sizes = [4, 32], strides = [1, 1]} : vector<4x128xf32> to vector<4x32xf32>
    %143 = vector.extract_strided_slice %141 {offsets = [0, 32], sizes = [4, 32], strides = [1, 1]} : vector<4x128xf32> to vector<4x32xf32>
    %144 = vector.extract_strided_slice %141 {offsets = [0, 64], sizes = [4, 32], strides = [1, 1]} : vector<4x128xf32> to vector<4x32xf32>
    %cst_38 = arith.constant 2.000000e+00 : f32
    %145 = vector.broadcast %cst_38 : f32 to vector<4x32xf32>
    %146 = arith.mulf %145, %144 : vector<4x32xf32>
    %cst_39 = arith.constant 1.000000e+00 : f32
    %147 = vector.broadcast %cst_39 : f32 to vector<4x32xf32>
    %148 = arith.subf %146, %147 : vector<4x32xf32>
    %149 = vector.extract_strided_slice %141 {offsets = [0, 96], sizes = [4, 32], strides = [1, 1]} : vector<4x128xf32> to vector<4x32xf32>
    %150 = arith.mulf %143, %131 : vector<4x32xf32>
    %151 = arith.mulf %142, %148 : vector<4x32xf32>
    %152 = arith.addf %150, %151 : vector<4x32xf32>
    %153 = math.tanh %152 : vector<4x32xf32>
    %154 = arith.mulf %149, %153 : vector<4x32xf32>
    %155 = vector.extract_strided_slice %25 {offsets = [24, 0], sizes = [4, 128], strides = [1, 1]} : vector<32x128xf32> to vector<4x128xf32>
    %cst_40 = arith.constant dense<0.000000e+00> : vector<4x128xf32>
    %156 = tpu.matmul %154, %26, %cst_40 {dimension_numbers = #tpu.dot_dimension_numbers<[1], [0], [0], [1], [0, 0, 1, 1], [], []>} : vector<4x32xf32>, vector<32x128xf32>, vector<4x128xf32> -> vector<4x128xf32>
    %157 = arith.addf %155, %156 : vector<4x128xf32>
    %158 = arith.negf %157 : vector<4x128xf32>
    %159 = math.exp %158 : vector<4x128xf32>
    %cst_41 = arith.constant 1.000000e+00 : f32
    %160 = vector.broadcast %cst_41 : f32 to vector<4x128xf32>
    %161 = arith.addf %160, %159 : vector<4x128xf32>
    %162 = arith.divf %160, %161 : vector<4x128xf32>
    %163 = vector.extract_strided_slice %162 {offsets = [0, 0], sizes = [4, 32], strides = [1, 1]} : vector<4x128xf32> to vector<4x32xf32>
    %164 = vector.extract_strided_slice %162 {offsets = [0, 32], sizes = [4, 32], strides = [1, 1]} : vector<4x128xf32> to vector<4x32xf32>
    %165 = vector.extract_strided_slice %162 {offsets = [0, 64], sizes = [4, 32], strides = [1, 1]} : vector<4x128xf32> to vector<4x32xf32>
    %cst_42 = arith.constant 2.000000e+00 : f32
    %166 = vector.broadcast %cst_42 : f32 to vector<4x32xf32>
    %167 = arith.mulf %166, %165 : vector<4x32xf32>
    %cst_43 = arith.constant 1.000000e+00 : f32
    %168 = vector.broadcast %cst_43 : f32 to vector<4x32xf32>
    %169 = arith.subf %167, %168 : vector<4x32xf32>
    %170 = vector.extract_strided_slice %162 {offsets = [0, 96], sizes = [4, 32], strides = [1, 1]} : vector<4x128xf32> to vector<4x32xf32>
    %171 = arith.mulf %164, %152 : vector<4x32xf32>
    %172 = arith.mulf %163, %169 : vector<4x32xf32>
    %173 = arith.addf %171, %172 : vector<4x32xf32>
    %174 = math.tanh %173 : vector<4x32xf32>
    %175 = arith.mulf %170, %174 : vector<4x32xf32>
    %176 = vector.extract_strided_slice %25 {offsets = [28, 0], sizes = [4, 128], strides = [1, 1]} : vector<32x128xf32> to vector<4x128xf32>
    %cst_44 = arith.constant dense<0.000000e+00> : vector<4x128xf32>
    %177 = tpu.matmul %175, %26, %cst_44 {dimension_numbers = #tpu.dot_dimension_numbers<[1], [0], [0], [1], [0, 0, 1, 1], [], []>} : vector<4x32xf32>, vector<32x128xf32>, vector<4x128xf32> -> vector<4x128xf32>
    %178 = arith.addf %176, %177 : vector<4x128xf32>
    %179 = arith.negf %178 : vector<4x128xf32>
    %180 = math.exp %179 : vector<4x128xf32>
    %cst_45 = arith.constant 1.000000e+00 : f32
    %181 = vector.broadcast %cst_45 : f32 to vector<4x128xf32>
    %182 = arith.addf %181, %180 : vector<4x128xf32>
    %183 = arith.divf %181, %182 : vector<4x128xf32>
    %184 = vector.extract_strided_slice %183 {offsets = [0, 0], sizes = [4, 32], strides = [1, 1]} : vector<4x128xf32> to vector<4x32xf32>
    %185 = vector.extract_strided_slice %183 {offsets = [0, 32], sizes = [4, 32], strides = [1, 1]} : vector<4x128xf32> to vector<4x32xf32>
    %186 = vector.extract_strided_slice %183 {offsets = [0, 64], sizes = [4, 32], strides = [1, 1]} : vector<4x128xf32> to vector<4x32xf32>
    %cst_46 = arith.constant 2.000000e+00 : f32
    %187 = vector.broadcast %cst_46 : f32 to vector<4x32xf32>
    %188 = arith.mulf %187, %186 : vector<4x32xf32>
    %cst_47 = arith.constant 1.000000e+00 : f32
    %189 = vector.broadcast %cst_47 : f32 to vector<4x32xf32>
    %190 = arith.subf %188, %189 : vector<4x32xf32>
    %191 = vector.extract_strided_slice %183 {offsets = [0, 96], sizes = [4, 32], strides = [1, 1]} : vector<4x128xf32> to vector<4x32xf32>
    %192 = arith.mulf %185, %173 : vector<4x32xf32>
    %193 = arith.mulf %184, %190 : vector<4x32xf32>
    %194 = arith.addf %192, %193 : vector<4x32xf32>
    %195 = math.tanh %194 : vector<4x32xf32>
    %196 = arith.mulf %191, %195 : vector<4x32xf32>
    %197 = arith.mulf %196, %196 : vector<4x32xf32>
    %cst_48 = arith.constant dense<0.000000e+00> : vector<4xf32>
    %198 = vector.multi_reduction <add>, %197, %cst_48 [1] : vector<4x32xf32> to vector<4xf32>
    %199 = vector.shape_cast %198 : vector<4xf32> to vector<4x1xf32>
    %200 = math.sqrt %199 : vector<4x1xf32>
    %cst_49 = arith.constant 9.99999996E-13 : f32
    %201 = vector.broadcast %cst_49 : f32 to vector<4x1xf32>
    %202 = arith.maximumf %200, %201 : vector<4x1xf32>
    %203 = vector.broadcast %202 : vector<4x1xf32> to vector<4x32xf32>
    %204 = arith.divf %196, %203 : vector<4x32xf32>
    %cst_50 = arith.constant 0.000000e+00 : f32
    %205 = vector.broadcast %cst_50 : f32 to vector<4x96xf32>
    %206 = tpu.concatenate %204, %205 in 1 : vector<4x32xf32>, vector<4x96xf32> -> vector<4x128xf32>
    %207 = tpu.concatenate %206, %13 in 0 : vector<4x128xf32>, vector<4x128xf32> -> vector<8x128xf32>
    %c0_51 = arith.constant 0 : index
    %c0_52 = arith.constant 0 : index
    %208 = vector.load %arg4[%c0_51, %c0_52] : memref<8x128xf32, #tpu.memory_space<vmem>>, vector<8x128xf32>
    tpu.vector_store %arg4[%c0_51, %c0_52], %207 {strides = array<i32>} : memref<8x128xf32, #tpu.memory_space<vmem>>, vector<8x128xf32>,
    return
  }
  func.func @transform_0(%arg0: i32) -> (i32, i32) {
    %c0_i32 = arith.constant 0 : i32
    %c0_i32_0 = arith.constant 0 : i32
    %c0_i32_1 = arith.constant 0 : i32
    return %c0_i32, %c0_i32_0 : i32, i32
  }
  func.func @transform_1(%arg0: i32) -> (i32, i32) {
    %c0_i32 = arith.constant 0 : i32
    %c0_i32_0 = arith.constant 0 : i32
    %c0_i32_1 = arith.constant 0 : i32
    return %c0_i32, %c0_i32_0 : i32, i32
  }
  func.func @transform_2(%arg0: i32) -> (i32, i32) {
    %c0_i32 = arith.constant 0 : i32
    %c0_i32_0 = arith.constant 0 : i32
    %c0_i32_1 = arith.constant 0 : i32
    return %c0_i32, %c0_i32_0 : i32, i32
  }
  func.func @transform_3(%arg0: i32) -> (i32, i32) {
    %c0_i32 = arith.constant 0 : i32
    %c0_i32_0 = arith.constant 0 : i32
    %c0_i32_1 = arith.constant 0 : i32
    return %c0_i32, %c0_i32_0 : i32, i32
  }
}

</mosaic_0001>

<bundles_post_ra>
// kernel: tpu_custom_call.1
= control target key start
LH: loop header
LB: loop body
LE: loop exit
PB: predicated region body
PF: predicated region fallthrough
CT: control target
= control target key end

     0   :  { %8 = vsyncpa [#allocation3], 0  ;;  %s1732_s0 = inlined_call_operand.vmem [shape: s32[32,1], index: 0, kind: input, shape index: {}]   ;;  %s1733_s1 = inlined_call_operand.vmem [shape: f32[4,64], index: 1, kind: input, shape index: {}]   ;;  %s1734_s2 = inlined_call_operand.hbm [shape: f32[240,128], index: 2, kind: input, shape index: {}]   ;;  %s1735_s3 = inlined_call_operand.hbm [shape: f32[8,128], index: 3, kind: output, shape index: {}]  }
   0x1   :  { %9 = vsyncpa [#allocation4], 0  ;;  %s1514_s12 = smov [#allocation2]  }
   0x2   :  { %s19_s13 = sshll.u32 %s1514_s12, 4  ;;  %s20_s13 = int_to_ptr.vmem [resolvable:$true] %s19_s13 }
   0x3   :  { %s1478_s14 = scalar_lea.vmem %s20_s13, 3840  ;;  %p1483_p1 = scmp.lt.s32.totalorder %s20_s13, %s20_s13 }
   0x4   :  { %p1479_p0 = scmp.ne.s32.totalorder %s20_s13, %s1478_s14  ;;  %p1484_p2 = scmp.lt.s32.totalorder %s1478_s14, %s1478_s14 }
   0x6   :  { %p1485_p3 = por %p1484_p2, %p1483_p1 }
   0x8   :  { %p1486_p4 = pnand %p1485_p3, %p1479_p0 }
   0xa   :  { %1489 = shalt.err (!%p1486_p4)
}
   0xb   :  { %s1515_s15 = smov 128   ;;  %s1516_s16 = smov 8  }
   0xc   :  { %25 = dma.hbm_to_vmem [thread:$0]  %s1734_s2, 3840, %s20_s13, [#allocation3], %s1515_s15, %s1515_s15, %s1516_s16  }
   0xd   :  { %1510 = dma.done.wait [#allocation3], 3840  }
   0xe   :  { %1511 = vsyncadd [#allocation3], 4294963456  ;;  %v1517_v0 = vmov 0   ;;  %v1518_v1 = vmov 0.0   ;;  %vm1519_vm0 = vmmov 0   ;;  %v132_v2 = vld [vmem:[%s1732_s0] sm:$0xff]  ;;  %v136_v33 = vlaneseq }
   0xf   :  { %1412 = vset.pattern.permute.xlu0 %v1517_v0  ;;  %1257 = vmatprep.subr.mxu0 %v1518_v1  ;;  %v173_v3 = vld [vmem:[#allocation2 + $0x78] sm:$0xff]  ;;  %v172_v4 = vld [vmem:[#allocation2 + $0x70] sm:$0xff]  ;;  %v133_v5 = vld [vmem:[%s1732_s0 + $0x8] sm:$0xff]  ;;  %vm43_vm1 = vcmask 523264   ;;  %v1520_v36 = vmov 1.0   ;;  %s1522_s24 = smov 32  }
  0x10   :  { %1273 = vmatprep.mubr.msk.f32.mxu0 %vm1519_vm0, %v1518_v1  ;;  %1413 = vset.pattern.permute.xlu1 %v1517_v0  ;;  %v171_v6 = vld [vmem:[#allocation2 + $0x68] sm:$0xff]  ;;  %v36_v7 = vld [vmem:[#allocation2 + $0xe0] sm:$0xff]  ;;  %v35_v8 = vld [vmem:[#allocation2 + $0xd8] sm:$0xff]  ;;  %v1597_v34 = vand.u32 127, %v136_v33  ;;  %vm268_vm4 = vcmask 261120   ;;  %vm118_vm7 = vcmask 1043456  }
  0x11   :  { %139 = vperm.xlu0 %1412, %v132_v2   ;;  %1276 = vmatprep.subr.mxu1 %v173_v3  ;;  %v170_v9 = vld [vmem:[#allocation2 + $0x60] sm:$0xff]  ;;  %v34_v10 = vld [vmem:[#allocation2 + $0xd0] sm:$0xff]  ;;  %v169_v11 = vld [vmem:[#allocation2 + $0x58] sm:$0xff]  ;;  %vm1116_vm8 = vcmask 261124  }
  0x12   :  { %1277 = vmatpush3.msra.mxu1 %v173_v3  ;;  %1258 = vmatpush3.msra.mxu0 %v36_v7  ;;  %v33_v12 = vld [vmem:[#allocation2 + $0xc8] sm:$0xff]  ;;  %v168_v13 = vld [vmem:[#allocation2 + $0x50] sm:$0xff]  ;;  %v32_v14 = vld [vmem:[#allocation2 + $0xc0] sm:$0xff] }
  0x13   :  { %1278 = vmatprep.subr.mxu1 %v172_v4  ;;  %1259 = vmatprep.subr.mxu0 %v1518_v1  ;;  %v167_v15 = vld [vmem:[#allocation2 + $0x48] sm:$0xff]  ;;  %v31_v16 = vld [vmem:[#allocation2 + $0xb8] sm:$0xff]  ;;  %v166_v17 = vld [vmem:[#allocation2 + $0x40] sm:$0xff] }
  0x14   :  { %1279 = vmatpush3.msra.mxu1 %v172_v4  ;;  %1260 = vmatpush3.msra.mxu0 %v35_v8  ;;  %v30_v18 = vld [vmem:[#allocation2 + $0xb0] sm:$0xff]  ;;  %v165_v19 = vld [vmem:[#allocation2 + $0x38] sm:$0xff]  ;;  %v29_v20 = vld [vmem:[#allocation2 + $0xa8] sm:$0xff] }
  0x15   :  { %142 = vperm.xlu0 %1412, %v133_v5   ;;  %1280 = vmatprep.subr.mxu1 %v171_v6  ;;  %v164_v21 = vld [vmem:[#allocation2 + $0x30] sm:$0xff]  ;;  %v38_v22 = vld [vmem:[%s1733_s1] sm:$0xf]  ;;  %v163_v23 = vld [vmem:[#allocation2 + $0x28] sm:$0xff]  ;;  %s1521_s1 = smov 64  }
  0x16   :  { %1281 = vmatpush3.msra.mxu1 %v171_v6  ;;  %1261 = vmatprep.subr.mxu0 %v1518_v1  ;;  %v1566_v24 = vld [vmem:[#allocation2 + $0x98] sm:$0xff]  ;;  %v162_v25 = vld [vmem:[#allocation2 + $0x20] sm:$0xff]  ;;  %v1569_v26 = vld [vmem:[#allocation2 + $0x90] sm:$0xff] }
  0x17   :  { %1282 = vmatprep.subr.mxu1 %v170_v9  ;;  %1262 = vmatpush3.msra.mxu0 %v34_v10  ;;  %v161_v27 = vld [vmem:[#allocation2 + $0x18] sm:$0xff]  ;;  %v1573_v28 = vld [vmem:[#allocation2 + $0x88] sm:$0xff]  ;;  %v160_v29 = vld [vmem:[#allocation2 + $0x10] sm:$0xff] }
  0x18   :  { %1283 = vmatpush3.msra.mxu1 %v170_v9  ;;  %1263 = vmatprep.subr.mxu0 %v1518_v1  ;;  %v1577_v30 = vld [vmem:[#allocation2 + $0x80] sm:$0xff]  ;;  %v159_v31 = vld [vmem:[#allocation2 + $0x8] sm:$0xff] }
  0x19   :  { %1284 = vmatprep.subr.mxu1 %v169_v11  ;;  %1264 = vmatpush3.msra.mxu0 %v33_v12  ;;  %v158_v32 = vld [vmem:[#allocation2] sm:$0xff] }
  0x1a   :  { %1285 = vmatpush3.msra.mxu1 %v169_v11  ;;  %1265 = vmatprep.subr.mxu0 %v1518_v1  ;;  %v1615_v43 = vld [vmem:[#allocation2 + $0xa0] ss:$0 sm:$0xff] }
  0x1b   :  { %1286 = vmatprep.subr.mxu1 %v168_v13  ;;  %1266 = vmatpush3.msra.mxu0 %v32_v14 }
  0x1c   :  { %1287 = vmatpush3.msra.mxu1 %v168_v13  ;;  %1267 = vmatprep.subr.mxu0 %v1518_v1 }
  0x1d   :  { %1288 = vmatprep.subr.mxu1 %v167_v15  ;;  %1268 = vmatpush3.msra.mxu0 %v31_v16 }
  0x1e   :  { %1289 = vmatpush3.msra.mxu1 %v167_v15  ;;  %1269 = vmatprep.subr.mxu0 %v1518_v1 }
  0x1f   :  { %1290 = vmatprep.subr.mxu1 %v166_v17  ;;  %1270 = vmatpush3.msra.mxu0 %v30_v18 }
  0x20   :  { %1291 = vmatpush3.msra.mxu1 %v166_v17  ;;  %1271 = vmatprep.subr.mxu0 %v1518_v1 }
  0x21   :  { %1292 = vmatprep.subr.mxu1 %v165_v19  ;;  %1272 = vmatpush3.msra.mxu0 %v29_v20 }
  0x22   :  { %1293 = vmatpush3.msra.mxu1 %v165_v19  ;;  %1314 = vmatprep.subr.mxu0 %v1518_v1 }
  0x23   :  { %1294 = vmatprep.subr.mxu1 %v164_v21  ;;  %1274 = vmatmul.mubr.msk.f32.vlgmr.msra.gmra.mxu0 %vm43_vm1, %v38_v22 }
  0x24   :  { %1295 = vmatpush3.msra.mxu1 %v164_v21  ;;  %1315 = vmatpush3.msra.mxu0 %v1566_v24 }
  0x25   :  { %1296 = vmatprep.subr.mxu1 %v163_v23  ;;  %1316 = vmatprep.subr.mxu0 %v1518_v1 }
  0x26   :  { %1297 = vmatpush3.msra.mxu1 %v163_v23  ;;  %1317 = vmatpush3.msra.mxu0 %v1569_v26 }
  0x27   :  { %1298 = vmatprep.subr.mxu1 %v162_v25  ;;  %1318 = vmatprep.subr.mxu0 %v1518_v1 }
  0x28   :  { %1299 = vmatpush3.msra.mxu1 %v162_v25  ;;  %1319 = vmatpush3.msra.mxu0 %v1573_v28 }
  0x29   :  { %1300 = vmatprep.subr.mxu1 %v161_v27  ;;  %1320 = vmatprep.subr.mxu0 %v1518_v1 }
  0x2a   :  { %1301 = vmatpush3.msra.mxu1 %v161_v27  ;;  %1321 = vmatpush3.msra.mxu0 %v1577_v30 }
  0x2b   :  { %1302 = vmatprep.subr.mxu1 %v160_v29  ;;  %1322 = vmatprep.mubr.msk.f32.mxu0 %vm1519_vm0, %v1518_v1 }
  0x2c   :  { %1303 = vmatpush3.msra.mxu1 %v160_v29  ;;  %1323 = vmatmul.mubr.f32.vlgmr.msra.gmra.mxu0 %v1518_v1 }
  0x2d   :  { %1304 = vmatprep.subr.mxu1 %v159_v31  ;;  %1325 = vmatprep.subr.mxu0 %v1518_v1 }
  0x2e   :  { %1305 = vmatpush3.msra.mxu1 %v159_v31  ;;  %1326 = vmatpush3.msra.mxu0 %v1566_v24 }
  0x2f   :  { %1306 = vmatprep.subr.mxu1 %v158_v32  ;;  %1327 = vmatprep.subr.mxu0 %v1518_v1 }
  0x30   :  { %1307 = vmatpush3.msra.mxu1 %v158_v32  ;;  %1328 = vmatpush3.msra.mxu0 %v1569_v26 }
  0x31   :  { %1333 = vmatprep.mubr.msk.f32.mxu0 %vm1519_vm0, %v1518_v1  ;;  %1329 = vmatprep.subr.mxu0 %v1518_v1 }
  0x32   :  { %1347 = vmatprep.subr.mxu1 %v1518_v1  ;;  %1330 = vmatpush3.msra.mxu0 %v1573_v28 }
  0x33   :  { %1331 = vmatprep.subr.mxu0 %v1518_v1 }
  0x34   :  { %1332 = vmatpush3.msra.mxu0 %v1577_v30 }
  0x35   :  { %1336 = vmatprep.subr.mxu0 %v1518_v1 }
  0x8c   :  { %v140_v35 = vpop.permute.xlu0 %139 }
  0x8d   :  { %vm150_vm2 = vcmp.eq.s32.totalorder %v1597_v34, %v140_v35 }
  0x8e   :  { %1308 = vmatprep.mubr.msk.f32.mxu1 %vm150_vm2, %v1520_v36 }
  0x90   :  { %v143_v37 = vpop.permute.xlu0 %142 }
  0x91   :  { %vm151_vm3 = vcmp.eq.s32.totalorder %v1597_v34, %v143_v37 }
  0x92   :  { %1309 = vmatmul.mubr.msk.f32.vlgmr.msra.gmra.mxu1 %vm151_vm3, %v1520_v36 }
  0x93   :  { %1348 = vmatpush3.msra.mxu1 %v1566_v24 }
  0x94   :  { %1349 = vmatprep.subr.mxu1 %v1518_v1 }
  0x95   :  { %1350 = vmatpush3.msra.mxu1 %v1569_v26 }
  0x96   :  { %1351 = vmatprep.subr.mxu1 %v1518_v1 }
  0x97   :  { %1352 = vmatpush3.msra.mxu1 %v1573_v28 }
  0x98   :  { %1353 = vmatprep.subr.mxu1 %v1518_v1 }
  0x99   :  { %1354 = vmatpush3.msra.mxu1 %v1577_v30 }
  0x9a   :  { %1369 = vmatprep.subr.mxu1 %v1518_v1 }
  0xe3   :  { %v1611_v38 = vpop.f32.mrf.mxu0 }
  0xe5   :  { %v1275_v39 = vpop.f32.mrf.mxu0 }
  0xe6   :  { %v134_v39 = vld [vmem:[%s1732_s0 + $0x10] sm:$0xff] }
  0xec   :  { %v338_v40 = vpop.f32.mrf.mxu0 }
  0xee   :  { %v1324_v41 = vpop.f32.mrf.mxu0 }
 0x152   :  { %v1613_v42 = vpop.f32.mrf.mxu1 }
 0x153   :  { %v251_v20 = vadd.f32 %v1613_v42, %v1615_v43 }
 0x154   :  { %v245_v44 = vpop.f32.mrf.mxu1 }
 0x155   :  { %v246_v45 = vadd.f32 %v1615_v43, %v245_v44 }
 0x157   :  { %v342_v46 = vadd.f32 %v338_v40, %v246_v45 }
 0x159   :  { %v1165_v47 = vmul.f32 -1.442695, %v342_v46 }
 0x15b   :  { %1414 = vpow2.f32 %v1165_v47  ;;  %v135_v47 = vld [vmem:[%s1732_s0 + $0x18] sm:$0xff]  ;;  %s1523_s0 = smov [#allocation5]  }
 0x15c   :  { %s1149_s29 = sshll.u32 %s1523_s0, 4  ;;  %s1150_s29 = int_to_ptr.vmem [resolvable:$true] %s1149_s29 }
 0x15d   :  { %s1490_s30 = scalar_lea.vmem %s1150_s29, 128  ;;  %p1495_p6 = scmp.lt.s32.totalorder %s1150_s29, %s1150_s29 }
 0x15e   :  { %p1491_p5 = scmp.ne.s32.totalorder %s1150_s29, %s1490_s30  ;;  %p1496_p7 = scmp.lt.s32.totalorder %s1490_s30, %s1490_s30 }
 0x160   :  { %p1497_p8 = por %p1496_p7, %p1495_p6 }
 0x162   :  { %p1498_p9 = pnand %p1497_p8, %p1491_p5 }
 0x168   :  { %v1415_v48 = vpop.eup %1414 }
 0x169   :  { %v346_v49 = vadd.f32 1.0, %v1415_v48 }
 0x16b   :  { %1416 = vrcp.f32 %v346_v49 }
 0x178   :  { %v1417_v50 = vpop.eup %1416 }
 0x179   :  { %v349_v51 = vmul.f32 2.0, %v1417_v50  ;;  %v351_v55 = vmul.f32 0.0, %v1417_v50 }
 0x17b   :  { %v1166_v52 = vadd.f32 -1.0, %v349_v51 }
 0x17d   :  { %353 = vrot.lane.b32.xlu1 %v1166_v52, %s1521_s1 }
 0x1ef   :  { %v354_v53 = vpop.permute.xlu1 %353 }
 0x1f0   :  { %v356_v54 = vmul.f32 %v1417_v50, %v354_v53 }
 0x1f2   :  { %358 = vrot.lane.b32.xlu1 %v356_v54, %s1522_s24 }
 0x264   :  { %v359_v56 = vpop.permute.xlu1 %358 }
 0x265   :  { %v361_v57 = vadd.f32 %v359_v56, %v351_v55 }
 0x267   :  { %1418 = vtanh.f32 %v361_v57  ;;  %v456_v11 = vrot.slane %v361_v57, 4 }
 0x274   :  { %v1419_v58 = vpop.eup %1418 }
 0x275   :  { %364 = vrot.lane.b32.xlu0 %v1419_v58, %s1521_s1 }
 0x2e7   :  { %v365_v59 = vpop.permute.xlu0 %364 }
 0x2e8   :  { %v367_v60 = vmul.f32 %v1417_v50, %v365_v59 }
 0x2ea   :  { %369 = vrot.lane.b32.xlu1 %v367_v60, %s1522_s24 }
 0x35c   :  { %v370_v61 = vpop.permute.xlu1 %369 }
 0x35d   :  { %1334 = vmatmul.mubr.msk.f32.vlgmr.msra.gmra.mxu0 %vm268_vm4, %v370_v61 }
 0x35e   :  { %1337 = vmatpush3.msra.mxu0 %v1566_v24  ;;  %1344 = vmatprep.mubr.msk.f32.mxu0 %vm1519_vm0, %v1518_v1 }
 0x35f   :  { %1338 = vmatprep.subr.mxu0 %v1518_v1 }
 0x360   :  { %1339 = vmatpush3.msra.mxu0 %v1569_v26 }
 0x361   :  { %1340 = vmatprep.subr.mxu0 %v1518_v1 }
 0x362   :  { %1341 = vmatpush3.msra.mxu0 %v1573_v28 }
 0x363   :  { %1342 = vmatprep.subr.mxu0 %v1518_v1 }
 0x364   :  { %1343 = vmatpush3.msra.mxu0 %v1577_v30 }
 0x365   :  { %1358 = vmatprep.subr.mxu0 %v1518_v1 }
 0x41d   :  { %v439_v62 = vpop.f32.mrf.mxu0 }
 0x41e   :  { %v444_v63 = vrot.slane %v439_v62, 4 }
 0x41f   :  { %v1335_v0 = vpop.f32.mrf.mxu0 }
 0x420   :  { %v446_v2 = vadd.f32 %v444_v63, %v246_v45 }
 0x422   :  { %v1168_v3 = vmul.f32 -1.442695, %v446_v2 }
 0x424   :  { %1420 = vpow2.f32 %v1168_v3 }
 0x431   :  { %v1421_v4 = vpop.eup %1420 }
 0x432   :  { %v450_v5 = vadd.f32 1.0, %v1421_v4 }
 0x434   :  { %1422 = vrcp.f32 %v450_v5 }
 0x441   :  { %v1423_v6 = vpop.eup %1422 }
 0x442   :  { %v453_v7 = vmul.f32 2.0, %v1423_v6  ;;  %v458_v12 = vmul.f32 %v1423_v6, %v456_v11 }
 0x444   :  { %v1169_v8 = vadd.f32 -1.0, %v453_v7 }
 0x446   :  { %460 = vrot.lane.b32.xlu0 %v1169_v8, %s1521_s1 }
 0x4b8   :  { %v461_v9 = vpop.permute.xlu0 %460 }
 0x4b9   :  { %v463_v10 = vmul.f32 %v1423_v6, %v461_v9 }
 0x4bb   :  { %465 = vrot.lane.b32.xlu1 %v463_v10, %s1522_s24 }
 0x52d   :  { %v466_v13 = vpop.permute.xlu1 %465 }
 0x52e   :  { %v468_v14 = vadd.f32 %v466_v13, %v458_v12 }
 0x530   :  { %1424 = vtanh.f32 %v468_v14  ;;  %v561_v40 = vrot.slane %v468_v14, 4 }
 0x53d   :  { %v1425_v15 = vpop.eup %1424 }
 0x53e   :  { %471 = vrot.lane.b32.xlu0 %v1425_v15, %s1521_s1 }
 0x5b0   :  { %v472_v16 = vpop.permute.xlu0 %471 }
 0x5b1   :  { %v474_v17 = vmul.f32 %v1423_v6, %v472_v16 }
 0x5b3   :  { %v476_v18 = vrot.slane %v474_v17, 4 }
 0x5b5   :  { %477 = vrot.lane.b32.xlu1 %v476_v18, %s1522_s24 }
 0x627   :  { %v478_v19 = vpop.permute.xlu1 %477 }
 0x628   :  { %1345 = vmatmul.mubr.msk.f32.vlgmr.msra.gmra.mxu0 %vm268_vm4, %v478_v19 }
 0x629   :  { %1359 = vmatpush3.msra.mxu0 %v1566_v24  ;;  %1366 = vmatprep.mubr.msk.f32.mxu0 %vm1519_vm0, %v1518_v1 }
 0x62a   :  { %1360 = vmatprep.subr.mxu0 %v1518_v1 }
 0x62b   :  { %1361 = vmatpush3.msra.mxu0 %v1569_v26 }
 0x62c   :  { %1362 = vmatprep.subr.mxu0 %v1518_v1 }
 0x62d   :  { %1363 = vmatpush3.msra.mxu0 %v1573_v28 }
 0x62e   :  { %1364 = vmatprep.subr.mxu0 %v1518_v1 }
 0x62f   :  { %1365 = vmatpush3.msra.mxu0 %v1577_v30 }
 0x630   :  { %1380 = vmatprep.subr.mxu0 %v1518_v1 }
 0x6e8   :  { %v547_v21 = vpop.f32.mrf.mxu0 }
 0x6e9   :  { %v551_v22 = vadd.f32 %v547_v21, %v251_v20 }
 0x6ea   :  { %v1346_v23 = vpop.f32.mrf.mxu0 }
 0x6eb   :  { %v1171_v25 = vmul.f32 -1.442695, %v551_v22 }
 0x6ed   :  { %1426 = vpow2.f32 %v1171_v25 }
 0x6fa   :  { %v1427_v27 = vpop.eup %1426 }
 0x6fb   :  { %v555_v29 = vadd.f32 1.0, %v1427_v27 }
 0x6fd   :  { %1428 = vrcp.f32 %v555_v29 }
 0x70a   :  { %v1429_v31 = vpop.eup %1428 }
 0x70b   :  { %v558_v32 = vmul.f32 2.0, %v1429_v31  ;;  %v563_v41 = vmul.f32 %v1429_v31, %v561_v40 }
 0x70d   :  { %v1172_v33 = vadd.f32 -1.0, %v558_v32 }
 0x70f   :  { %565 = vrot.lane.b32.xlu0 %v1172_v33, %s1521_s1 }
 0x781   :  { %v566_v35 = vpop.permute.xlu0 %565 }
 0x782   :  { %v568_v37 = vmul.f32 %v1429_v31, %v566_v35 }
 0x784   :  { %570 = vrot.lane.b32.xlu1 %v568_v37, %s1522_s24 }
 0x788   :  { %145 = vperm.xlu1 %1413, %v134_v39  }
 0x7f6   :  { %v571_v42 = vpop.permute.xlu1 %570 }
 0x7f7   :  { %v573_v44 = vadd.f32 %v571_v42, %v563_v41 }
 0x7f9   :  { %1430 = vtanh.f32 %v573_v44  ;;  %v668_v0 = vrot.slane %v573_v44, 4 }
 0x803   :  { %v146_v45 = vpop.permute.xlu1 %145 }
 0x804   :  { %vm152_vm5 = vcmp.eq.s32.totalorder %v1597_v34, %v146_v45 }
 0x805   :  { %1311 = vmatprep.mubr.msk.f32.mxu1 %vm152_vm5, %v1520_v36 }
 0x806   :  { %v1431_v46 = vpop.eup %1430 }
 0x807   :  { %576 = vrot.lane.b32.xlu0 %v1431_v46, %s1521_s1 }
 0x80b   :  { %148 = vperm.xlu0 %1412, %v135_v47  }
 0x879   :  { %v577_v48 = vpop.permute.xlu0 %576 }
 0x87a   :  { %v579_v49 = vmul.f32 %v1429_v31, %v577_v48 }
 0x87c   :  { %581 = vrot.lane.b32.xlu1 %v579_v49, %s1522_s24 }
 0x886   :  { %v149_v50 = vpop.permute.xlu0 %148 }
 0x887   :  { %vm153_vm6 = vcmp.eq.s32.totalorder %v1597_v34, %v149_v50 }
 0x888   :  { %1312 = vmatmul.mubr.msk.f32.gmra.mxu1 %vm153_vm6, %v1520_v36 }
 0x889   :  { %1355 = vmatprep.mubr.msk.f32.mxu1 %vm1519_vm0, %v1518_v1 }
 0x8ee   :  { %v582_v51 = vpop.permute.xlu1 %581 }
 0x8ef   :  { %1356 = vmatmul.mubr.msk.f32.vlgmr.msra.gmra.mxu1 %vm268_vm4, %v582_v51 }
 0x8f0   :  { %1370 = vmatpush3.msra.mxu1 %v1566_v24  ;;  %1377 = vmatprep.mubr.msk.f32.mxu1 %vm1519_vm0, %v1518_v1 }
 0x8f1   :  { %1371 = vmatprep.subr.mxu1 %v1518_v1 }
 0x8f2   :  { %1372 = vmatpush3.msra.mxu1 %v1569_v26 }
 0x8f3   :  { %1373 = vmatprep.subr.mxu1 %v1518_v1 }
 0x8f4   :  { %1374 = vmatpush3.msra.mxu1 %v1573_v28 }
 0x8f5   :  { %1375 = vmatprep.subr.mxu1 %v1518_v1 }
 0x8f6   :  { %1376 = vmatpush3.msra.mxu1 %v1577_v30 }
 0x8f7   :  { %1391 = vmatprep.subr.mxu1 %v1518_v1 }
 0x948   :  { %v1677_v34 = vpop.f32.mrf.mxu1 }
 0x94a   :  { %v255_v36 = vpop.f32.mrf.mxu1 }
 0x94b   :  { %v256_v10 = vadd.f32 %v1615_v43, %v255_v36 }
 0x9af   :  { %v651_v52 = vpop.f32.mrf.mxu1 }
 0x9b0   :  { %v656_v53 = vrot.slane %v651_v52, 4 }
 0x9b1   :  { %v1357_v54 = vpop.f32.mrf.mxu1 }
 0x9b2   :  { %v658_v55 = vadd.f32 %v656_v53, %v251_v20  ;;  %v261_v53 = vadd.f32 %v1677_v34, %v1615_v43 }
 0x9b4   :  { %v1174_v56 = vmul.f32 -1.442695, %v658_v55 }
 0x9b6   :  { %1432 = vpow2.f32 %v1174_v56 }
 0x9c3   :  { %v1433_v57 = vpop.eup %1432 }
 0x9c4   :  { %v662_v58 = vadd.f32 1.0, %v1433_v57 }
 0x9c6   :  { %1434 = vrcp.f32 %v662_v58 }
 0x9d3   :  { %v1435_v59 = vpop.eup %1434 }
 0x9d4   :  { %v665_v60 = vmul.f32 2.0, %v1435_v59  ;;  %v670_v2 = vmul.f32 %v1435_v59, %v668_v0 }
 0x9d6   :  { %v1175_v61 = vadd.f32 -1.0, %v665_v60 }
 0x9d8   :  { %672 = vrot.lane.b32.xlu0 %v1175_v61, %s1521_s1 }
 0xa4a   :  { %v673_v62 = vpop.permute.xlu0 %672 }
 0xa4b   :  { %v675_v63 = vmul.f32 %v1435_v59, %v673_v62 }
 0xa4d   :  { %677 = vrot.lane.b32.xlu1 %v675_v63, %s1522_s24 }
 0xabf   :  { %v678_v3 = vpop.permute.xlu1 %677 }
 0xac0   :  { %v680_v4 = vadd.f32 %v678_v3, %v670_v2 }
 0xac2   :  { %1436 = vtanh.f32 %v680_v4  ;;  %v773_v22 = vrot.slane %v680_v4, 4 }
 0xacf   :  { %v1437_v5 = vpop.eup %1436 }
 0xad0   :  { %683 = vrot.lane.b32.xlu0 %v1437_v5, %s1521_s1 }
 0xb42   :  { %v684_v6 = vpop.permute.xlu0 %683 }
 0xb43   :  { %v686_v7 = vmul.f32 %v1435_v59, %v684_v6 }
 0xb45   :  { %v688_v8 = vrot.slane %v686_v7, 4 }
 0xb47   :  { %689 = vrot.lane.b32.xlu1 %v688_v8, %s1522_s24 }
 0xbb9   :  { %v690_v9 = vpop.permute.xlu1 %689 }
 0xbba   :  { %1367 = vmatmul.mubr.msk.f32.vlgmr.msra.gmra.mxu0 %vm268_vm4, %v690_v9 }
 0xbbb   :  { %1381 = vmatpush3.msra.mxu0 %v1566_v24  ;;  %1388 = vmatprep.mubr.msk.f32.mxu0 %vm1519_vm0, %v1518_v1 }
 0xbbc   :  { %1382 = vmatprep.subr.mxu0 %v1518_v1 }
 0xbbd   :  { %1383 = vmatpush3.msra.mxu0 %v1569_v26 }
 0xbbe   :  { %1384 = vmatprep.subr.mxu0 %v1518_v1 }
 0xbbf   :  { %1385 = vmatpush3.msra.mxu0 %v1573_v28 }
 0xbc0   :  { %1386 = vmatprep.subr.mxu0 %v1518_v1 }
 0xbc1   :  { %1387 = vmatpush3.msra.mxu0 %v1577_v30 }
 0xc7a   :  { %v759_v11 = vpop.f32.mrf.mxu0 }
 0xc7b   :  { %v763_v12 = vadd.f32 %v759_v11, %v256_v10 }
 0xc7c   :  { %v1368_v13 = vpop.f32.mrf.mxu0 }
 0xc7d   :  { %v1177_v14 = vmul.f32 -1.442695, %v763_v12 }
 0xc7f   :  { %1438 = vpow2.f32 %v1177_v14 }
 0xc8c   :  { %v1439_v15 = vpop.eup %1438 }
 0xc8d   :  { %v767_v16 = vadd.f32 1.0, %v1439_v15 }
 0xc8f   :  { %1440 = vrcp.f32 %v767_v16 }
 0xc9c   :  { %v1441_v17 = vpop.eup %1440 }
 0xc9d   :  { %v770_v18 = vmul.f32 2.0, %v1441_v17  ;;  %v775_v23 = vmul.f32 %v1441_v17, %v773_v22 }
 0xc9f   :  { %v1178_v19 = vadd.f32 -1.0, %v770_v18 }
 0xca1   :  { %777 = vrot.lane.b32.xlu0 %v1178_v19, %s1521_s1 }
 0xd13   :  { %v778_v20 = vpop.permute.xlu0 %777 }
 0xd14   :  { %v780_v21 = vmul.f32 %v1441_v17, %v778_v20 }
 0xd16   :  { %782 = vrot.lane.b32.xlu1 %v780_v21, %s1522_s24 }
 0xd88   :  { %v783_v25 = vpop.permute.xlu1 %782 }
 0xd89   :  { %v785_v27 = vadd.f32 %v783_v25, %v775_v23 }
 0xd8b   :  { %1442 = vtanh.f32 %v785_v27 }
 0xd98   :  { %v1443_v29 = vpop.eup %1442 }
 0xd99   :  { %788 = vrot.lane.b32.xlu0 %v1443_v29, %s1521_s1 }
 0xe0b   :  { %v789_v31 = vpop.permute.xlu0 %788 }
 0xe0c   :  { %v791_v32 = vmul.f32 %v1441_v17, %v789_v31 }
 0xe0e   :  { %793 = vrot.lane.b32.xlu1 %v791_v32, %s1522_s24  ;;  %v1158_v32 = vld [vmem:[#allocation2 + $0xe8] ss:$0 sm:$0xff] }
 0xe80   :  { %v794_v33 = vpop.permute.xlu1 %793 }
 0xe81   :  { %1378 = vmatmul.mubr.msk.f32.vlgmr.msra.gmra.mxu1 %vm268_vm4, %v794_v33  ;;  %v114_v33 = vadd.f32 %v1158_v32, %v1611_v38 }
 0xe82   :  { %1392 = vmatpush3.msra.mxu1 %v1566_v24  ;;  %1399 = vmatprep.mubr.msk.f32.mxu1 %vm1519_vm0, %v1518_v1 }
 0xe83   :  { %1393 = vmatprep.subr.mxu1 %v1518_v1 }
 0xe84   :  { %1394 = vmatpush3.msra.mxu1 %v1569_v26 }
 0xe85   :  { %1395 = vmatprep.subr.mxu1 %v1518_v1 }
 0xe86   :  { %1396 = vmatpush3.msra.mxu1 %v1573_v28 }
 0xe87   :  { %1397 = vmatprep.subr.mxu1 %v1518_v1  ;;  %v880_v1 = vrot.slane %v785_v27, 4 }
 0xe88   :  { %1398 = vmatpush3.msra.mxu1 %v1577_v30 }
 0xf41   :  { %v863_v35 = vpop.f32.mrf.mxu1 }
 0xf42   :  { %v868_v37 = vrot.slane %v863_v35, 4  ;;  %v117_v35 = vmul.f32 %v114_v33, %v114_v33 }
 0xf43   :  { %v1379_v39 = vpop.f32.mrf.mxu1 }
 0xf44   :  { %v870_v40 = vadd.f32 %v868_v37, %v256_v10  ;;  %v119_v37 = vsel %vm118_vm7, %v117_v35, 0.0 }
 0xf46   :  { %v1180_v24 = vmul.f32 -1.442695, %v870_v40 }
 0xf48   :  { %1444 = vpow2.f32 %v1180_v24 }
 0xf55   :  { %v1445_v41 = vpop.eup %1444 }
 0xf56   :  { %v874_v42 = vadd.f32 1.0, %v1445_v41 }
 0xf58   :  { %1446 = vrcp.f32 %v874_v42 }
 0xf65   :  { %v1447_v44 = vpop.eup %1446 }
 0xf66   :  { %v877_v45 = vmul.f32 2.0, %v1447_v44  ;;  %v882_v30 = vmul.f32 %v1447_v44, %v880_v1 }
 0xf68   :  { %v1181_v26 = vadd.f32 -1.0, %v877_v45 }
 0xf6a   :  { %884 = vrot.lane.b32.xlu0 %v1181_v26, %s1521_s1 }
 0xfdc   :  { %v885_v46 = vpop.permute.xlu0 %884 }
 0xfdd   :  { %v887_v28 = vmul.f32 %v1447_v44, %v885_v46 }
 0xfdf   :  { %889 = vrot.lane.b32.xlu1 %v887_v28, %s1522_s24 }
0x1051   :  { %v890_v47 = vpop.permute.xlu1 %889 }
0x1052   :  { %v892_v48 = vadd.f32 %v890_v47, %v882_v30 }
0x1054   :  { %1448 = vtanh.f32 %v892_v48  ;;  %v985_v2 = vrot.slane %v892_v48, 4 }
0x1061   :  { %v1449_v49 = vpop.eup %1448 }
0x1062   :  { %895 = vrot.lane.b32.xlu0 %v1449_v49, %s1521_s1 }
0x10d4   :  { %v896_v50 = vpop.permute.xlu0 %895 }
0x10d5   :  { %v898_v51 = vmul.f32 %v1447_v44, %v896_v50 }
0x10d7   :  { %v900_v36 = vrot.slane %v898_v51, 4 }
0x10d9   :  { %901 = vrot.lane.b32.xlu1 %v900_v36, %s1522_s24 }
0x114b   :  { %v902_v52 = vpop.permute.xlu1 %901 }
0x114c   :  { %1389 = vmatmul.mubr.msk.f32.vlgmr.msra.gmra.mxu0 %vm268_vm4, %v902_v52 }
0x120c   :  { %v971_v54 = vpop.f32.mrf.mxu0 }
0x120d   :  { %v975_v55 = vadd.f32 %v971_v54, %v261_v53 }
0x120e   :  { %v1390_v56 = vpop.f32.mrf.mxu0 }
0x120f   :  { %v1183_v57 = vmul.f32 -1.442695, %v975_v55 }
0x1211   :  { %1450 = vpow2.f32 %v1183_v57 }
0x121e   :  { %v1451_v58 = vpop.eup %1450 }
0x121f   :  { %v979_v59 = vadd.f32 1.0, %v1451_v58 }
0x1221   :  { %1452 = vrcp.f32 %v979_v59 }
0x122e   :  { %v1453_v60 = vpop.eup %1452 }
0x122f   :  { %v982_v61 = vmul.f32 2.0, %v1453_v60  ;;  %v987_v3 = vmul.f32 %v1453_v60, %v985_v2 }
0x1231   :  { %v1184_v62 = vadd.f32 -1.0, %v982_v61 }
0x1233   :  { %989 = vrot.lane.b32.xlu0 %v1184_v62, %s1521_s1 }
0x12a5   :  { %v990_v63 = vpop.permute.xlu0 %989 }
0x12a6   :  { %v992_v0 = vmul.f32 %v1453_v60, %v990_v63 }
0x12a8   :  { %994 = vrot.lane.b32.xlu1 %v992_v0, %s1522_s24 }
0x131a   :  { %v995_v43 = vpop.permute.xlu1 %994 }
0x131b   :  { %v997_v34 = vadd.f32 %v995_v43, %v987_v3 }
0x131d   :  { %1454 = vtanh.f32 %v997_v34  ;;  %v1092_v20 = vrot.slane %v997_v34, 4 }
0x132a   :  { %v1455_v4 = vpop.eup %1454 }
0x132b   :  { %1000 = vrot.lane.b32.xlu0 %v1455_v4, %s1521_s1 }
0x139d   :  { %v1001_v5 = vpop.permute.xlu0 %1000 }
0x139e   :  { %v1003_v6 = vmul.f32 %v1453_v60, %v1001_v5 }
0x13a0   :  { %1005 = vrot.lane.b32.xlu1 %v1003_v6, %s1522_s24 }
0x1412   :  { %v1006_v7 = vpop.permute.xlu1 %1005 }
0x1413   :  { %1400 = vmatmul.mubr.msk.f32.vlgmr.msra.gmra.mxu1 %vm268_vm4, %v1006_v7 }
0x14d3   :  { %v1075_v8 = vpop.f32.mrf.mxu1 }
0x14d4   :  { %v1080_v9 = vrot.slane %v1075_v8, 4 }
0x14d5   :  { %v1401_v10 = vpop.f32.mrf.mxu1 }
0x14d6   :  { %v1082_v11 = vadd.f32 %v1080_v9, %v261_v53 }
0x14d8   :  { %v1186_v12 = vmul.f32 -1.442695, %v1082_v11 }
0x14da   :  { %1456 = vpow2.f32 %v1186_v12 }
0x14e7   :  { %v1457_v13 = vpop.eup %1456 }
0x14e8   :  { %v1086_v14 = vadd.f32 1.0, %v1457_v13 }
0x14ea   :  { %1458 = vrcp.f32 %v1086_v14 }
0x14f7   :  { %v1459_v15 = vpop.eup %1458 }
0x14f8   :  { %v1089_v16 = vmul.f32 2.0, %v1459_v15  ;;  %v1094_v21 = vmul.f32 %v1459_v15, %v1092_v20 }
0x14fa   :  { %v1187_v17 = vadd.f32 -1.0, %v1089_v16 }
0x14fc   :  { %1096 = vrot.lane.b32.xlu0 %v1187_v17, %s1521_s1 }
0x156e   :  { %v1097_v18 = vpop.permute.xlu0 %1096 }
0x156f   :  { %v1099_v19 = vmul.f32 %v1459_v15, %v1097_v18 }
0x1571   :  { %1101 = vrot.lane.b32.xlu1 %v1099_v19, %s1522_s24 }
0x15e3   :  { %v1102_v22 = vpop.permute.xlu1 %1101 }
0x15e4   :  { %v1104_v23 = vadd.f32 %v1102_v22, %v1094_v21 }
0x15e6   :  { %1460 = vtanh.f32 %v1104_v23 }
0x15f3   :  { %v1461_v25 = vpop.eup %1460 }
0x15f4   :  { %1107 = vrot.lane.b32.xlu0 %v1461_v25, %s1521_s1 }
0x1666   :  { %v1108_v27 = vpop.permute.xlu0 %1107 }
0x1667   :  { %v1110_v29 = vmul.f32 %v1459_v15, %v1108_v27 }
0x1669   :  { %v1111_v31 = vmul.f32 %v1110_v29, %v1110_v29 }
0x166b   :  { %1113 = vrot.lane.b32.xlu1 %v1111_v31, %s1522_s24 }
0x168f   :  { %120 = vadd.xlane.f32.xlu1 %v119_v37 }
0x16dd   :  { %v1114_v39 = vpop.permute.xlu1 %1113 }
0x16de   :  { %v1117_v40 = vsel %vm1116_vm8, %v1114_v39, 0.0 }
0x16df   :  { %1118 = vadd.xlane.f32.xlu0 %v1117_v40 }
0x1718   :  { %v121_v1 = vpop.xlane.xlu1 %120 }
0x1719   :  { %vm124_vm11 = vcmp.eq.f32.partialorder %v121_v1, inf  ;;  %v127_v49 = vand.u32 2147483648, %v121_v1  ;;  %vm126_vm12 = vcmp.eq.f32.partialorder %v121_v1, 0.0 }
0x1768   :  { %v1119_v24 = vpop.xlane.xlu0 %1118 }
0x1769   :  { %1462 = vrsqrt.f32 %v1119_v24  ;;  %vm1122_vm9 = vcmp.eq.f32.partialorder %v1119_v24, inf  ;;  %v1125_v44 = vand.u32 2147483648, %v1119_v24  ;;  %vm1124_vm10 = vcmp.eq.f32.partialorder %v1119_v24, 0.0 }
0x1776   :  { %v1463_v41 = vpop.eup %1462 }
0x1777   :  { %v1121_v42 = vmul.f32 %v1463_v41, %v1119_v24 }
0x1779   :  { %v1123_v45 = vsel %vm1122_vm9, %v1119_v24, %v1121_v42 }
0x177a   :  { %v1126_v26 = vsel %vm1124_vm10, %v1125_v44, %v1123_v45 }
0x177b   :  { %v1127_v46 = vmax.f32 %v1126_v26, 1e-12 }
0x177d   :  { %1464 = vrcp.f32 %v1127_v46 }
0x177e   :  { %1466 = vrsqrt.f32 %v121_v1 }
0x178a   :  { %v1465_v38 = vpop.eup %1464 }
0x178b   :  { %v1129_v28 = vmul.f32 %v1465_v38, %v1110_v29  ;;  %v1467_v30 = vpop.eup %1466 }
0x178c   :  { %v123_v47 = vmul.f32 %v1467_v30, %v121_v1 }
0x178d   :  { %1131 = vrot.lane.b32.xlu0 %v1129_v28, %s1522_s24 }
0x178e   :  { %v125_v48 = vsel %vm124_vm11, %v121_v1, %v123_v47 }
0x178f   :  { %v128_v50 = vsel %vm126_vm12, %v127_v49, %v125_v48 }
0x1790   :  { %v129_v51 = vmax.f32 %v128_v50, 1e-12 }
0x1792   :  { %1468 = vrcp.f32 %v129_v51 }
0x179f   :  { %v1469_v36 = vpop.eup %1468 }
0x17a0   :  { %v131_v52 = vmul.f32 %v1469_v36, %v114_v33 }
0x17a2   :  { %v1139_v56 = vrot.slane %v131_v52, 4 }
0x17ff   :  { %v1132_v53 = vpop.permute.xlu0 %1131 }
0x1800   :  { %v1134_v54 = vsel %vm268_vm4, %v1132_v53, 0.0 }
0x1801   :  { %v1136_v55 = vrot.slane %v1134_v54, 4 }
0x1803   :  { %v1141_v57 = vsel %vm118_vm7, %v1136_v55, %v1139_v56 }
0x1804   :  { %1142 = vst [vmem:[#allocation5] sm:$0xff] %v1141_v57 }
0x1805   :  { %1501 = shalt.err (!%p1498_p9)
}
0x1806   :  { %1152 = dma.vmem_to_hbm [thread:$0]  %s1150_s29, 128, %s1735_s3, [#allocation4]  }
0x1807   :  { %1512 = dma.done.wait [#allocation4], 128  }
0x1808   :  { %1513 = vsyncadd [#allocation4], 4294967168 }
0x1809   :  { %1156 = vsyncpa [#allocation3], 1 }
0x180a   :  { %1157 = vsyncpa [#allocation4], 1 }

</bundles_post_ra>
